<compile_context>
chip_gen: v7x
topology: tpu7x:2x2x1
jax: 0.10.0
libtpu: 0.0.40
codegen_flags: <defaults>
</compile_context>

<pallas_src>
import functools

import jax
import jax.numpy as jnp
from jax.experimental import pallas as pl
from jax.experimental.pallas import tpu as pltpu


def _round_up(x, m):
    return (x + m - 1) // m * m


def _lorta_embed_gather_kernel(
    ids_ref,      # SMEM (tiles_in_call, tt) int32 token ids (scalar prefetch)
    tbl_hbm,      # HBM  (V, 2*Dp) packed rows [W | scaling*dW]  (pl.ANY)
    out_ref,      # VMEM (tt, Dp) output tile
    stage,        # VMEM (tt, 2*Dp) gathered packed rows
    sem,          # DMA semaphore array, shape (1,)
    *,
    tokens_per_tile,
    d_pad,
    unroll,
):
    tile = pl.program_id(0)

    # --- Gather: ONE row DMA per token; all copies proceed concurrently. ------
    @pl.loop(0, tokens_per_tile // unroll)
    def _(g):
        base = pl.multiple_of(g * unroll, unroll)
        for u in range(unroll):                    # static partial unroll (x8)
            t = base + u
            tok = ids_ref[tile, t]
            pltpu.make_async_copy(tbl_hbm.at[tok], stage.at[t], sem.at[0]).start()

    # --- Single aggregate wait: DMA semaphores count bytes; the staging block's
    #     total byte count equals the sum of all row copies issued above, so one
    #     wait drains the semaphore exactly (replaces the per-row drain loop).
    pltpu.make_async_copy(stage, stage, sem.at[0]).wait()

    # --- Combine gathered rows: out = W[x] + scaling*dW[x] (scaling was folded
    #     into the packed table by the wrapper).  Both slices are lane-tile
    #     aligned because d_pad is a multiple of 128.
    out_ref[...] = (stage[:, :d_pad] + stage[:, d_pad:]).astype(out_ref.dtype)


def lorta_embedding(x, w_base, dw, scaling, *, token_tile=512):
    """x: (B, S) int token ids; w_base/dw: (V, D); scaling: float -> (B, S, D)."""
    b, s = x.shape
    v, d = w_base.shape
    assert dw.shape == (v, d), "adapter_weight must match the base embedding shape"
    n = b * s

    dtype = w_base.dtype
    itemsize = jnp.dtype(dtype).itemsize
    d_pad = _round_up(d, 128)                 # lane-dense last dim

    # ---- token tile sizing (multiple of 8 sublanes) --------------------------
    tt = min(int(token_tile), _round_up(n, 8))
    # VMEM per grid step: stage (tt, 2*Dp) + double-buffered out (2 * tt * Dp).
    budget_bytes = 16 * 1024 * 1024
    per_token_bytes = 4 * d_pad * itemsize
    tt = min(tt, max(8, (budget_bytes // per_token_bytes) // 8 * 8))
    if n > 8:   # keep >= 2 tiles so the "parallel" axis can use both v7x cores
        tt = min(tt, _round_up(pl.cdiv(n, 2), 8))
    tt = max(8, _round_up(tt, 8))
    unroll = 8

    n_tiles = pl.cdiv(n, tt)
    n_pad = n_tiles * tt

    # ---- ids: clamp (no OOB HBM DMA), pad, 2-D for SMEM scalar prefetch ------
    ids = jnp.clip(x.reshape(n).astype(jnp.int32), 0, v - 1)
    if n_pad != n:
        ids = jnp.concatenate([ids, jnp.zeros((n_pad - n,), jnp.int32)])
    ids2d = ids.reshape(n_tiles, tt)

    # ---- packed table [W | scaling*dW], last dim zero-padded to 128 ----------
    dw_scaled = (dw.astype(jnp.float32) * jnp.asarray(scaling, jnp.float32)).astype(dtype)
    w_p = w_base
    if d_pad != d:
        padcfg = ((0, 0), (0, d_pad - d))
        w_p = jnp.pad(w_p, padcfg)
        dw_scaled = jnp.pad(dw_scaled, padcfg)
    tbl = jnp.concatenate([w_p, dw_scaled], axis=1)          # (V, 2*Dp)

    kernel = functools.partial(
        _lorta_embed_gather_kernel,
        tokens_per_tile=tt, d_pad=d_pad, unroll=unroll)

    def run_chunk(ids_chunk):
        nt = ids_chunk.shape[0]
        return pl.pallas_call(
            kernel,
            out_shape=jax.ShapeDtypeStruct((nt * tt, d_pad), dtype),
            grid_spec=pltpu.PrefetchScalarGridSpec(
                num_scalar_prefetch=1,                 # ids -> SMEM before the grid
                grid=(nt,),
                in_specs=[pl.BlockSpec(memory_space=pl.ANY)],  # table stays in HBM
                out_specs=pl.BlockSpec((tt, d_pad), lambda i, ids: (i, 0)),
                scratch_shapes=[
                    pltpu.VMEM((tt, 2 * d_pad), dtype),
                    pltpu.SemaphoreType.DMA((1,)),
                ],
            ),
            compiler_params=pltpu.CompilerParams(
                dimension_semantics=("parallel",),     # independent token tiles
                vmem_limit_bytes=48 * 1024 * 1024,
            ),
        )(ids_chunk, tbl)

    # Chunk very large id arrays across calls so the SMEM-resident id block stays
    # small (<= 128 KiB); typical sizes take the single-call path.
    max_ids_per_call = 32768
    tiles_per_call = max(1, max_ids_per_call // tt)
    if n_tiles <= tiles_per_call:
        out_flat = run_chunk(ids2d)
    else:
        outs = [run_chunk(ids2d[c:c + tiles_per_call])
                for c in range(0, n_tiles, tiles_per_call)]
        out_flat = jnp.concatenate(outs, axis=0)

    return out_flat[:n, :d].reshape(b, s, d)


if __name__ == "__main__":
    # small shapes consistent with an nn.Embedding base layer
    B, S = 2, 8           # batch, sequence
    V, D = 256, 128       # num_embeddings (in_features), embedding_dim (out_features)
    r, lora_alpha = 8, 16
    scaling = lora_alpha / r   # update_layer: lora_alpha / r (use_rslora=False)

    key = jax.random.PRNGKey(0)
    k_ids, k_w, k_dw = jax.random.split(key, 3)

    x = jax.random.randint(k_ids, (B, S), 0, V, dtype=jnp.int32)
    w_base = jax.random.normal(k_w, (V, D), dtype=jnp.float32)
    dw = jax.random.normal(k_dw, (V, D), dtype=jnp.float32) * 0.02  # adapter dW

    out = lorta_embedding(x, w_base, dw, scaling)
    out = jax.block_until_ready(out)

    # pure-JAX reference: base embedding + scaling * adapter embedding
    ref = w_base[x] + scaling * dw[x]
    assert out.shape == (B, S, D)
    assert jnp.allclose(out, ref, atol=1e-5, rtol=1e-5), "mismatch vs reference"

    print("KERNEL_OK")
</pallas_src>

<mosaic_0001>
module attributes {stable_mosaic.version = 11 : i64} {
  func.func @_lorta_embed_gather_kernel(%arg0: i32, %arg1: memref<2x8xi32, #tpu.memory_space<smem>>, %arg2: memref<256x256xf32, #tpu.memory_space<any>>, %arg3: memref<8x128xf32, #tpu.memory_space<vmem>>, %arg4: memref<8x256xf32, #tpu.memory_space<vmem>>, %arg5: memref<1x!tpu.dma_semaphore, #tpu.memory_space<semaphore_mem>>) attributes {dimension_semantics = [#tpu.dimension_semantics<parallel>], iteration_bounds = array<i64: 2>, scalar_prefetch = 1 : i64, scratch_operands = 2 : i64, tpu.core_type = #tpu.core_type<tc>, window_params = [{}, {transform_indices = @transform_1, window_bounds = array<i64: 8, 128>}]} {
    %c0_i32 = arith.constant 0 : i32
    %c1_i32 = arith.constant 1 : i32
    %0 = arith.muli %c0_i32, %c1_i32 : i32
    %c0_i32_0 = arith.constant 0 : i32
    %1 = arith.addi %c0_i32_0, %0 : i32
    %c8_i32 = arith.constant 8 : i32
    %2 = arith.muli %1, %c8_i32 : i32
    %3 = tpu.assume_multiple %2, 8 : i32
    %c0_i32_1 = arith.constant 0 : i32
    %4 = arith.addi %3, %c0_i32_1 : i32
    %5 = arith.index_cast %arg0 : i32 to index
    %6 = arith.index_cast %4 : i32 to index
    %7 = memref.load %arg1[%5, %6] : memref<2x8xi32, #tpu.memory_space<smem>>
    %c0_i32_2 = arith.constant 0 : i32
    %c0_i32_3 = arith.constant 0 : i32
    %8 = tpu.memref_slice %arg2[%7, %c0_i32_3] : memref<256x256xf32, #tpu.memory_space<any>> -> memref<1x256xf32, #tpu.memory_space<any>>
    %9 = tpu.memref_squeeze %8 : memref<1x256xf32, #tpu.memory_space<any>> -> memref<256xf32, #tpu.memory_space<any>>
    %c0_i32_4 = arith.constant 0 : i32
    %10 = tpu.memref_slice %arg4[%4, %c0_i32_4] : memref<8x256xf32, #tpu.memory_space<vmem>> -> memref<1x256xf32, #tpu.memory_space<vmem>>
    %11 = tpu.memref_squeeze %10 : memref<1x256xf32, #tpu.memory_space<vmem>> -> memref<256xf32, #tpu.memory_space<vmem>>
    %12 = tpu.memref_slice %arg5[%c0_i32_2] : memref<1x!tpu.dma_semaphore, #tpu.memory_space<semaphore_mem>> -> memref<1x!tpu.dma_semaphore, #tpu.memory_space<semaphore_mem>>
    %13 = tpu.memref_squeeze %12 : memref<1x!tpu.dma_semaphore, #tpu.memory_space<semaphore_mem>> -> memref<!tpu.dma_semaphore, #tpu.memory_space<semaphore_mem>>
    tpu.enqueue_dma source(%9 : memref<256xf32, #tpu.memory_space<any>>) target(%11 : memref<256xf32, #tpu.memory_space<vmem>>) target_semaphore(%13 : memref<!tpu.dma_semaphore, #tpu.memory_space<semaphore_mem>>)
    %c1_i32_5 = arith.constant 1 : i32
    %14 = arith.addi %3, %c1_i32_5 : i32
    %15 = arith.index_cast %arg0 : i32 to index
    %16 = arith.index_cast %14 : i32 to index
    %17 = memref.load %arg1[%15, %16] : memref<2x8xi32, #tpu.memory_space<smem>>
    %c0_i32_6 = arith.constant 0 : i32
    %c0_i32_7 = arith.constant 0 : i32
    %18 = tpu.memref_slice %arg2[%17, %c0_i32_7] : memref<256x256xf32, #tpu.memory_space<any>> -> memref<1x256xf32, #tpu.memory_space<any>>
    %19 = tpu.memref_squeeze %18 : memref<1x256xf32, #tpu.memory_space<any>> -> memref<256xf32, #tpu.memory_space<any>>
    %c0_i32_8 = arith.constant 0 : i32
    %20 = tpu.memref_slice %arg4[%14, %c0_i32_8] : memref<8x256xf32, #tpu.memory_space<vmem>> -> memref<1x256xf32, #tpu.memory_space<vmem>>
    %21 = tpu.memref_squeeze %20 : memref<1x256xf32, #tpu.memory_space<vmem>> -> memref<256xf32, #tpu.memory_space<vmem>>
    %22 = tpu.memref_slice %arg5[%c0_i32_6] : memref<1x!tpu.dma_semaphore, #tpu.memory_space<semaphore_mem>> -> memref<1x!tpu.dma_semaphore, #tpu.memory_space<semaphore_mem>>
    %23 = tpu.memref_squeeze %22 : memref<1x!tpu.dma_semaphore, #tpu.memory_space<semaphore_mem>> -> memref<!tpu.dma_semaphore, #tpu.memory_space<semaphore_mem>>
    tpu.enqueue_dma source(%19 : memref<256xf32, #tpu.memory_space<any>>) target(%21 : memref<256xf32, #tpu.memory_space<vmem>>) target_semaphore(%23 : memref<!tpu.dma_semaphore, #tpu.memory_space<semaphore_mem>>)
    %c2_i32 = arith.constant 2 : i32
    %24 = arith.addi %3, %c2_i32 : i32
    %25 = arith.index_cast %arg0 : i32 to index
    %26 = arith.index_cast %24 : i32 to index
    %27 = memref.load %arg1[%25, %26] : memref<2x8xi32, #tpu.memory_space<smem>>
    %c0_i32_9 = arith.constant 0 : i32
    %c0_i32_10 = arith.constant 0 : i32
    %28 = tpu.memref_slice %arg2[%27, %c0_i32_10] : memref<256x256xf32, #tpu.memory_space<any>> -> memref<1x256xf32, #tpu.memory_space<any>>
    %29 = tpu.memref_squeeze %28 : memref<1x256xf32, #tpu.memory_space<any>> -> memref<256xf32, #tpu.memory_space<any>>
    %c0_i32_11 = arith.constant 0 : i32
    %30 = tpu.memref_slice %arg4[%24, %c0_i32_11] : memref<8x256xf32, #tpu.memory_space<vmem>> -> memref<1x256xf32, #tpu.memory_space<vmem>>
    %31 = tpu.memref_squeeze %30 : memref<1x256xf32, #tpu.memory_space<vmem>> -> memref<256xf32, #tpu.memory_space<vmem>>
    %32 = tpu.memref_slice %arg5[%c0_i32_9] : memref<1x!tpu.dma_semaphore, #tpu.memory_space<semaphore_mem>> -> memref<1x!tpu.dma_semaphore, #tpu.memory_space<semaphore_mem>>
    %33 = tpu.memref_squeeze %32 : memref<1x!tpu.dma_semaphore, #tpu.memory_space<semaphore_mem>> -> memref<!tpu.dma_semaphore, #tpu.memory_space<semaphore_mem>>
    tpu.enqueue_dma source(%29 : memref<256xf32, #tpu.memory_space<any>>) target(%31 : memref<256xf32, #tpu.memory_space<vmem>>) target_semaphore(%33 : memref<!tpu.dma_semaphore, #tpu.memory_space<semaphore_mem>>)
    %c3_i32 = arith.constant 3 : i32
    %34 = arith.addi %3, %c3_i32 : i32
    %35 = arith.index_cast %arg0 : i32 to index
    %36 = arith.index_cast %34 : i32 to index
    %37 = memref.load %arg1[%35, %36] : memref<2x8xi32, #tpu.memory_space<smem>>
    %c0_i32_12 = arith.constant 0 : i32
    %c0_i32_13 = arith.constant 0 : i32
    %38 = tpu.memref_slice %arg2[%37, %c0_i32_13] : memref<256x256xf32, #tpu.memory_space<any>> -> memref<1x256xf32, #tpu.memory_space<any>>
    %39 = tpu.memref_squeeze %38 : memref<1x256xf32, #tpu.memory_space<any>> -> memref<256xf32, #tpu.memory_space<any>>
    %c0_i32_14 = arith.constant 0 : i32
    %40 = tpu.memref_slice %arg4[%34, %c0_i32_14] : memref<8x256xf32, #tpu.memory_space<vmem>> -> memref<1x256xf32, #tpu.memory_space<vmem>>
    %41 = tpu.memref_squeeze %40 : memref<1x256xf32, #tpu.memory_space<vmem>> -> memref<256xf32, #tpu.memory_space<vmem>>
    %42 = tpu.memref_slice %arg5[%c0_i32_12] : memref<1x!tpu.dma_semaphore, #tpu.memory_space<semaphore_mem>> -> memref<1x!tpu.dma_semaphore, #tpu.memory_space<semaphore_mem>>
    %43 = tpu.memref_squeeze %42 : memref<1x!tpu.dma_semaphore, #tpu.memory_space<semaphore_mem>> -> memref<!tpu.dma_semaphore, #tpu.memory_space<semaphore_mem>>
    tpu.enqueue_dma source(%39 : memref<256xf32, #tpu.memory_space<any>>) target(%41 : memref<256xf32, #tpu.memory_space<vmem>>) target_semaphore(%43 : memref<!tpu.dma_semaphore, #tpu.memory_space<semaphore_mem>>)
    %c4_i32 = arith.constant 4 : i32
    %44 = arith.addi %3, %c4_i32 : i32
    %45 = arith.index_cast %arg0 : i32 to index
    %46 = arith.index_cast %44 : i32 to index
    %47 = memref.load %arg1[%45, %46] : memref<2x8xi32, #tpu.memory_space<smem>>
    %c0_i32_15 = arith.constant 0 : i32
    %c0_i32_16 = arith.constant 0 : i32
    %48 = tpu.memref_slice %arg2[%47, %c0_i32_16] : memref<256x256xf32, #tpu.memory_space<any>> -> memref<1x256xf32, #tpu.memory_space<any>>
    %49 = tpu.memref_squeeze %48 : memref<1x256xf32, #tpu.memory_space<any>> -> memref<256xf32, #tpu.memory_space<any>>
    %c0_i32_17 = arith.constant 0 : i32
    %50 = tpu.memref_slice %arg4[%44, %c0_i32_17] : memref<8x256xf32, #tpu.memory_space<vmem>> -> memref<1x256xf32, #tpu.memory_space<vmem>>
    %51 = tpu.memref_squeeze %50 : memref<1x256xf32, #tpu.memory_space<vmem>> -> memref<256xf32, #tpu.memory_space<vmem>>
    %52 = tpu.memref_slice %arg5[%c0_i32_15] : memref<1x!tpu.dma_semaphore, #tpu.memory_space<semaphore_mem>> -> memref<1x!tpu.dma_semaphore, #tpu.memory_space<semaphore_mem>>
    %53 = tpu.memref_squeeze %52 : memref<1x!tpu.dma_semaphore, #tpu.memory_space<semaphore_mem>> -> memref<!tpu.dma_semaphore, #tpu.memory_space<semaphore_mem>>
    tpu.enqueue_dma source(%49 : memref<256xf32, #tpu.memory_space<any>>) target(%51 : memref<256xf32, #tpu.memory_space<vmem>>) target_semaphore(%53 : memref<!tpu.dma_semaphore, #tpu.memory_space<semaphore_mem>>)
    %c5_i32 = arith.constant 5 : i32
    %54 = arith.addi %3, %c5_i32 : i32
    %55 = arith.index_cast %arg0 : i32 to index
    %56 = arith.index_cast %54 : i32 to index
    %57 = memref.load %arg1[%55, %56] : memref<2x8xi32, #tpu.memory_space<smem>>
    %c0_i32_18 = arith.constant 0 : i32
    %c0_i32_19 = arith.constant 0 : i32
    %58 = tpu.memref_slice %arg2[%57, %c0_i32_19] : memref<256x256xf32, #tpu.memory_space<any>> -> memref<1x256xf32, #tpu.memory_space<any>>
    %59 = tpu.memref_squeeze %58 : memref<1x256xf32, #tpu.memory_space<any>> -> memref<256xf32, #tpu.memory_space<any>>
    %c0_i32_20 = arith.constant 0 : i32
    %60 = tpu.memref_slice %arg4[%54, %c0_i32_20] : memref<8x256xf32, #tpu.memory_space<vmem>> -> memref<1x256xf32, #tpu.memory_space<vmem>>
    %61 = tpu.memref_squeeze %60 : memref<1x256xf32, #tpu.memory_space<vmem>> -> memref<256xf32, #tpu.memory_space<vmem>>
    %62 = tpu.memref_slice %arg5[%c0_i32_18] : memref<1x!tpu.dma_semaphore, #tpu.memory_space<semaphore_mem>> -> memref<1x!tpu.dma_semaphore, #tpu.memory_space<semaphore_mem>>
    %63 = tpu.memref_squeeze %62 : memref<1x!tpu.dma_semaphore, #tpu.memory_space<semaphore_mem>> -> memref<!tpu.dma_semaphore, #tpu.memory_space<semaphore_mem>>
    tpu.enqueue_dma source(%59 : memref<256xf32, #tpu.memory_space<any>>) target(%61 : memref<256xf32, #tpu.memory_space<vmem>>) target_semaphore(%63 : memref<!tpu.dma_semaphore, #tpu.memory_space<semaphore_mem>>)
    %c6_i32 = arith.constant 6 : i32
    %64 = arith.addi %3, %c6_i32 : i32
    %65 = arith.index_cast %arg0 : i32 to index
    %66 = arith.index_cast %64 : i32 to index
    %67 = memref.load %arg1[%65, %66] : memref<2x8xi32, #tpu.memory_space<smem>>
    %c0_i32_21 = arith.constant 0 : i32
    %c0_i32_22 = arith.constant 0 : i32
    %68 = tpu.memref_slice %arg2[%67, %c0_i32_22] : memref<256x256xf32, #tpu.memory_space<any>> -> memref<1x256xf32, #tpu.memory_space<any>>
    %69 = tpu.memref_squeeze %68 : memref<1x256xf32, #tpu.memory_space<any>> -> memref<256xf32, #tpu.memory_space<any>>
    %c0_i32_23 = arith.constant 0 : i32
    %70 = tpu.memref_slice %arg4[%64, %c0_i32_23] : memref<8x256xf32, #tpu.memory_space<vmem>> -> memref<1x256xf32, #tpu.memory_space<vmem>>
    %71 = tpu.memref_squeeze %70 : memref<1x256xf32, #tpu.memory_space<vmem>> -> memref<256xf32, #tpu.memory_space<vmem>>
    %72 = tpu.memref_slice %arg5[%c0_i32_21] : memref<1x!tpu.dma_semaphore, #tpu.memory_space<semaphore_mem>> -> memref<1x!tpu.dma_semaphore, #tpu.memory_space<semaphore_mem>>
    %73 = tpu.memref_squeeze %72 : memref<1x!tpu.dma_semaphore, #tpu.memory_space<semaphore_mem>> -> memref<!tpu.dma_semaphore, #tpu.memory_space<semaphore_mem>>
    tpu.enqueue_dma source(%69 : memref<256xf32, #tpu.memory_space<any>>) target(%71 : memref<256xf32, #tpu.memory_space<vmem>>) target_semaphore(%73 : memref<!tpu.dma_semaphore, #tpu.memory_space<semaphore_mem>>)
    %c7_i32 = arith.constant 7 : i32
    %74 = arith.addi %3, %c7_i32 : i32
    %75 = arith.index_cast %arg0 : i32 to index
    %76 = arith.index_cast %74 : i32 to index
    %77 = memref.load %arg1[%75, %76] : memref<2x8xi32, #tpu.memory_space<smem>>
    %c0_i32_24 = arith.constant 0 : i32
    %c0_i32_25 = arith.constant 0 : i32
    %78 = tpu.memref_slice %arg2[%77, %c0_i32_25] : memref<256x256xf32, #tpu.memory_space<any>> -> memref<1x256xf32, #tpu.memory_space<any>>
    %79 = tpu.memref_squeeze %78 : memref<1x256xf32, #tpu.memory_space<any>> -> memref<256xf32, #tpu.memory_space<any>>
    %c0_i32_26 = arith.constant 0 : i32
    %80 = tpu.memref_slice %arg4[%74, %c0_i32_26] : memref<8x256xf32, #tpu.memory_space<vmem>> -> memref<1x256xf32, #tpu.memory_space<vmem>>
    %81 = tpu.memref_squeeze %80 : memref<1x256xf32, #tpu.memory_space<vmem>> -> memref<256xf32, #tpu.memory_space<vmem>>
    %82 = tpu.memref_slice %arg5[%c0_i32_24] : memref<1x!tpu.dma_semaphore, #tpu.memory_space<semaphore_mem>> -> memref<1x!tpu.dma_semaphore, #tpu.memory_space<semaphore_mem>>
    %83 = tpu.memref_squeeze %82 : memref<1x!tpu.dma_semaphore, #tpu.memory_space<semaphore_mem>> -> memref<!tpu.dma_semaphore, #tpu.memory_space<semaphore_mem>>
    tpu.enqueue_dma source(%79 : memref<256xf32, #tpu.memory_space<any>>) target(%81 : memref<256xf32, #tpu.memory_space<vmem>>) target_semaphore(%83 : memref<!tpu.dma_semaphore, #tpu.memory_space<semaphore_mem>>)
    %c1_i32_27 = arith.constant 1 : i32
    %c0_i32_28 = arith.constant 0 : i32
    %84 = tpu.memref_slice %arg5[%c0_i32_28] : memref<1x!tpu.dma_semaphore, #tpu.memory_space<semaphore_mem>> -> memref<1x!tpu.dma_semaphore, #tpu.memory_space<semaphore_mem>>
    %85 = tpu.memref_squeeze %84 : memref<1x!tpu.dma_semaphore, #tpu.memory_space<semaphore_mem>> -> memref<!tpu.dma_semaphore, #tpu.memory_space<semaphore_mem>>
    tpu.wait_dma2 semaphore(%85 : memref<!tpu.dma_semaphore, #tpu.memory_space<semaphore_mem>>) src(%arg4 : memref<8x256xf32, #tpu.memory_space<vmem>>) dst(%arg4 : memref<8x256xf32, #tpu.memory_space<vmem>>)
    %c0 = arith.constant 0 : index
    %c0_29 = arith.constant 0 : index
    %86 = vector.load %arg4[%c0, %c0_29] : memref<8x256xf32, #tpu.memory_space<vmem>>, vector<8x128xf32>
    %c0_30 = arith.constant 0 : index
    %c128 = arith.constant 128 : index
    %87 = vector.load %arg4[%c0_30, %c128] : memref<8x256xf32, #tpu.memory_space<vmem>>, vector<8x128xf32>
    %88 = arith.addf %86, %87 : vector<8x128xf32>
    %c0_31 = arith.constant 0 : index
    %c0_32 = arith.constant 0 : index
    %89 = vector.load %arg3[%c0_31, %c0_32] : memref<8x128xf32, #tpu.memory_space<vmem>>, vector<8x128xf32>
    tpu.vector_store %arg3[%c0_31, %c0_32], %88 {strides = array<i32>} : memref<8x128xf32, #tpu.memory_space<vmem>>, vector<8x128xf32>,
    return
  }
  func.func @transform_1(%arg0: i32, %arg1: memref<2x8xi32, #tpu.memory_space<smem>>) -> (i32, i32) {
    %c0_i32 = arith.constant 0 : i32
    %c0_i32_0 = arith.constant 0 : i32
    return %arg0, %c0_i32 : i32, i32
  }
}

</mosaic_0001>

<bundles_post_ra>
// kernel: tpu_custom_call.1
= control target key start
LH: loop header
LB: loop body
LE: loop exit
PB: predicated region body
PF: predicated region fallthrough
CT: control target
= control target key end

     0   :  { %s1008_s0 = inlined_call_operand.hbm [shape: s32[2,8], index: 0, kind: input, shape index: {}]   ;;  %s1009_s1 = inlined_call_operand.hbm [shape: f32[256,256], index: 1, kind: input, shape index: {}]   ;;  %s1010_s2 = inlined_call_operand.hbm [shape: f32[16,128], index: 2, kind: output, shape index: {}]  }
   0x1   :  { %s444_s11 = scalar_lea.hbm %s1008_s0, 32 }
   0x2   :  { %p445_p0 = scmp.ne.s32.totalorder %s1008_s0, %s444_s11  ;;  %p448_p1 = scmp.lt.u32.totalorder %s444_s11, %s1008_s0 }
   0x4   :  { %p450_p2 = pnand %p448_p1, %p445_p0 }
   0x6   :  { %453 = shalt.err (!%p450_p2)  }
   0x7   :  { %s706_s16 = smov [#allocation5]  }
   0x8   :  { %8 = dma.hbm_to_smem %s1008_s0, 32, %s706_s16, [#allocation4] }
   0x9   :  { %686 = dma.done.wait [#allocation4], 32 }
   0xa   :  { %687 = vsyncadd [#allocation4], 4294967264 }
   0xb   :  { %10 = sfence }
   0xc   :  { %11 = vsyncpa [#allocation7], 0 }
   0xd   :  { %13 = vsyncpa [#allocation7 + $0x1], 0  ;;  %s745_s19 = smov 0   ;;  %s747_s20 = smov 0  }
   0xe   :  { %s749_s21 = smov 0  }
   0xf LB: > { %1016 = sst [smem:[#allocation19_spill]] %s696_s19  ;;  %s369_s0 = sadd.s32 4294967295, %s704_s21   ;;  %s704_s21 = sphi %s749_s21, %s1025_s21   ;;  %s700_s20 = sphi %s747_s20, %s1028_s20   ;;  %s696_s19 = sphi %s745_s19, %s1027_s19  }
  0x10   : > { %s762_s22 = sadd.s32 1, %s704_s21   ;;  %s25_s24 = sadd.s32 1, %s700_s20 }
  0x11   : > { %1017 = sst [smem:[#allocation20_spill]] %s762_s22  ;;  %s22_s23 = ssub.s32 %s704_s21, %s762_s22 }
  0x12   : > { %p23_p3 = scmp.eq.s32.totalorder %s22_s23, 0  ;;  %p370_p4 = scmp.ne.s32.totalorder %s22_s23, 0 }
  0x13   : > { %p29_p5 = scmp.eq.s32.totalorder %s704_s21, 1  ;;  %p34_p6 = scmp.ne.s32.totalorder %s700_s20, %s696_s19 }
  0x14   : > { %s771_s25 = scalar_select %p23_p3, %s700_s20, %s25_s24  }
  0x15   : > { %p773_p7 = por %p370_p4, %p29_p5  ;;  %p35_p8 = scmp.eq.s32.totalorder %s369_s0, 1 }
  0x16   : > { %1018 = sst [smem:[#allocation21_spill]] %s771_s25  ;;  %p371_p10 = scmp.ge.s32.totalorder %s704_s21, 2 }
  0x17   : > { %p777_p9 = por %p35_p8, %p34_p6  ;;  %s1011_s28 = sand.u32 (!%p371_p10), 1, %s700_s20  }
  0x18   : > { %44 = sbr.rel (%p371_p10) target bundleno = 254 (0xfe), region = 12  ;;  %s784_s29 = sshll.u32 (!%p371_p10), %s704_s21, 7 }
  0x19   : > { %s1020_s27 = scalar_select %p777_p9, 1, 0 }
  0x1a   : > { %s788_s30 = sshll.u32 (!%p371_p10), %s1011_s28, 3  ;;  %s55_s3 = sld [smem:[#allocation5 + %s784_s29]] (!%p371_p10) }
  0x1b   : > { %1021 = sst [smem:[#allocation22_spill]] %s1020_s27  ;;  %s707_s4 = smov (!%p371_p10), [#allocation2]  }
  0x1c   : > { %s66_s5 = sshll.u32 (!%p371_p10), %s707_s4, 4  ;;  %s77_s6 = sadd.s32 (!%p371_p10), 1, %s784_s29  ;;  %s791_s5 = int_to_ptr.vmem [resolvable:$true] %s66_s5 }
  0x1d   : > { %s794_s7 = sld [smem:[#allocation5 + %s77_s6]] (!%p371_p10)  ;;  %s708_s8 = smov (!%p371_p10), [#allocation2 + $0x1]  }
  0x1e   : > { %s91_s9 = sshll.u32 (!%p371_p10), %s708_s8, 4  ;;  %s102_s14 = sadd.s32 (!%p371_p10), 2, %s784_s29  ;;  %s796_s9 = int_to_ptr.vmem [resolvable:$true] %s91_s9 }
  0x1f   : > { %s799_s16 = sld [smem:[#allocation5 + %s102_s14]]  ;;  %s807_s6 = scalar_lea.hbm %s1009_s1, 8192 }
  0x20   : > { %s56_s10 = sshrl.u32 %s55_s3, 3  ;;  %s57_s11 = sand.u32 7, %s55_s3  }
  0x21   : > { %s374_s12 = sshll.u32 %s56_s10, 4 }
  0x22   : > { %s59_s13 = sadd.s32 %s374_s12, %s57_s11 }
  0x23   : > { %s375_s15 = sshll.u32 %s59_s13, 4 }
  0x24   : > { %s61_s0 = scalar_lea.hbm %s1009_s1, %s375_s15 }
  0x25   : > { %s454_s23 = scalar_lea.hbm %s61_s0, 32  ;;  %p457_p12 = scmp.lt.u32.totalorder %s61_s0, %s1009_s1 }
  0x26   : > { %p455_p11 = scmp.ne.s32.totalorder %s61_s0, %s454_s23  ;;  %p458_p13 = scmp.lt.u32.totalorder %s807_s6, %s454_s23 }
  0x27   : > { %p460_p1 = scmp.lt.u32.totalorder %s454_s23, %s61_s0 }
  0x28   : > { %p459_p0 = por %p458_p13, %p457_p12 }
  0x2a   : > { %p461_p2 = por %p460_p1, %p459_p0 }
  0x2c   : > { %p462_p3 = pnand %p461_p2, %p455_p11 }
  0x2e   : > { %465 = shalt.err (!%p462_p3)  }
  0x2f   : > { %s466_s10 = scalar_lea.vmem %s791_s5, 32  ;;  %s816_s11 = scalar_lea.vmem %s791_s5, 256 }
  0x30   : > { %p467_p4 = scmp.ne.s32.totalorder %s791_s5, %s466_s10  ;;  %p471_p5 = scmp.lt.s32.totalorder %s791_s5, %s791_s5 }
  0x31   : > { %p472_p6 = scmp.lt.s32.totalorder %s816_s11, %s466_s10 }
  0x33   : > { %p473_p8 = por %p472_p6, %p471_p5 }
  0x35   : > { %p474_p10 = pnand %p473_p8, %p467_p4 }
  0x37   : > { %477 = shalt.err (!%p474_p10)  }
  0x38   : > { %s709_s12 = smov 128   ;;  %s710_s13 = smov 1  }
  0x39   : > { %69 = dma.hbm_to_vmem [thread:$0]  %s61_s0, 32, %s791_s5, [#allocation3], %s709_s12, %s709_s12, %s710_s13 }
  0x3a   : > { %s79_s14 = sshrl.u32 %s794_s7, 3  ;;  %s80_s15 = sand.u32 7, %s794_s7  }
  0x3b   : > { %s377_s17 = sshll.u32 %s79_s14, 4  ;;  %s711_s18 = smov [#allocation2 + $0x2]  }
  0x3c   : > { %s116_s23 = sshll.u32 %s711_s18, 4  ;;  %s82_s24 = sadd.s32 %s377_s17, %s80_s15  ;;  %s827_s23 = int_to_ptr.vmem [resolvable:$true] %s116_s23 }
  0x3d   : > { %s378_s4 = sshll.u32 %s82_s24, 4  ;;  %s104_s3 = sshrl.u32 %s799_s16, 3 }
  0x3e   : > { %s84_s28 = scalar_lea.hbm %s1009_s1, %s378_s4  ;;  %s105_s25 = sand.u32 7, %s799_s16  }
  0x3f   : > { %s478_s22 = scalar_lea.hbm %s84_s28, 32  ;;  %p481_p12 = scmp.lt.u32.totalorder %s84_s28, %s1009_s1 }
  0x40   : > { %p479_p11 = scmp.ne.s32.totalorder %s84_s28, %s478_s22  ;;  %p482_p13 = scmp.lt.u32.totalorder %s807_s6, %s478_s22 }
  0x41   : > { %p484_p1 = scmp.lt.u32.totalorder %s478_s22, %s84_s28 }
  0x42   : > { %p483_p0 = por %p482_p13, %p481_p12 }
  0x44   : > { %p485_p2 = por %p484_p1, %p483_p0 }
  0x46   : > { %p486_p3 = pnand %p485_p2, %p479_p11 }
  0x48   : > { %489 = shalt.err (!%p486_p3)  }
  0x49   : > { %s490_s7 = scalar_lea.vmem %s796_s9, 32  ;;  %p495_p5 = scmp.lt.s32.totalorder %s796_s9, %s791_s5 }
  0x4a   : > { %p491_p4 = scmp.ne.s32.totalorder %s796_s9, %s490_s7  ;;  %p496_p6 = scmp.lt.s32.totalorder %s816_s11, %s490_s7 }
  0x4c   : > { %p497_p8 = por %p496_p6, %p495_p5 }
  0x4e   : > { %p498_p10 = pnand %p497_p8, %p491_p4 }
  0x50   : > { %501 = shalt.err (!%p498_p10)  }
  0x51   : > { %94 = dma.hbm_to_vmem [thread:$0]  %s84_s28, 32, %s796_s9, [#allocation3], %s709_s12, %s709_s12, %s710_s13 }
  0x52   : > { %s380_s19 = sshll.u32 %s104_s3, 4  ;;  %s127_s22 = sadd.s32 3, %s784_s29 }
  0x53   : > { %s107_s27 = sadd.s32 %s380_s19, %s105_s25  ;;  %s848_s16 = sld [smem:[#allocation5 + %s127_s22]] }
  0x54   : > { %s381_s0 = sshll.u32 %s107_s27, 4  ;;  %s712_s18 = smov [#allocation2 + $0x3]  }
  0x55   : > { %s109_s17 = scalar_lea.hbm %s1009_s1, %s381_s0  ;;  %s141_s24 = sshll.u32 %s712_s18, 4  ;;  %s866_s24 = int_to_ptr.vmem [resolvable:$true] %s141_s24 }
  0x56   : > { %s502_s4 = scalar_lea.hbm %s109_s17, 32  ;;  %p505_p12 = scmp.lt.u32.totalorder %s109_s17, %s1009_s1 }
  0x57   : > { %p503_p11 = scmp.ne.s32.totalorder %s109_s17, %s502_s4  ;;  %p506_p13 = scmp.lt.u32.totalorder %s807_s6, %s502_s4 }
  0x58   : > { %p508_p1 = scmp.lt.u32.totalorder %s502_s4, %s109_s17 }
  0x59   : > { %p507_p0 = por %p506_p13, %p505_p12 }
  0x5b   : > { %p509_p2 = por %p508_p1, %p507_p0 }
  0x5d   : > { %p510_p3 = pnand %p509_p2, %p503_p11 }
  0x5f   : > { %513 = shalt.err (!%p510_p3)  }
  0x60   : > { %s514_s25 = scalar_lea.vmem %s827_s23, 32  ;;  %p519_p5 = scmp.lt.s32.totalorder %s827_s23, %s791_s5 }
  0x61   : > { %p515_p4 = scmp.ne.s32.totalorder %s827_s23, %s514_s25  ;;  %p520_p6 = scmp.lt.s32.totalorder %s816_s11, %s514_s25 }
  0x63   : > { %p521_p8 = por %p520_p6, %p519_p5 }
  0x65   : > { %p522_p10 = pnand %p521_p8, %p515_p4 }
  0x67   : > { %525 = shalt.err (!%p522_p10)  }
  0x68   : > { %119 = dma.hbm_to_vmem [thread:$0]  %s109_s17, 32, %s827_s23, [#allocation3], %s709_s12, %s709_s12, %s710_s13 }
  0x69   : > { %s152_s28 = sadd.s32 4, %s784_s29  ;;  %s129_s3 = sshrl.u32 %s848_s16, 3 }
  0x6a   : > { %s869_s9 = sld [smem:[#allocation5 + %s152_s28]]  ;;  %s130_s7 = sand.u32 7, %s848_s16  }
  0x6b   : > { %s383_s19 = sshll.u32 %s129_s3, 4  ;;  %s713_s22 = smov [#allocation2 + $0x4]  }
  0x6c   : > { %s166_s27 = sshll.u32 %s713_s22, 4  ;;  %s132_s0 = sadd.s32 %s383_s19, %s130_s7  ;;  %s873_s27 = int_to_ptr.vmem [resolvable:$true] %s166_s27 }
  0x6d   : > { %s384_s14 = sshll.u32 %s132_s0, 4  ;;  %s177_s15 = sadd.s32 5, %s784_s29 }
  0x6e   : > { %s134_s23 = scalar_lea.hbm %s1009_s1, %s384_s14  ;;  %s879_s17 = sld [smem:[#allocation5 + %s177_s15]] }
  0x6f   : > { %s526_s8 = scalar_lea.hbm %s134_s23, 32  ;;  %p529_p12 = scmp.lt.u32.totalorder %s134_s23, %s1009_s1 }
  0x70   : > { %p527_p11 = scmp.ne.s32.totalorder %s134_s23, %s526_s8  ;;  %p530_p13 = scmp.lt.u32.totalorder %s807_s6, %s526_s8 }
  0x71   : > { %p532_p1 = scmp.lt.u32.totalorder %s526_s8, %s134_s23 }
  0x72   : > { %p531_p0 = por %p530_p13, %p529_p12 }
  0x74   : > { %p533_p2 = por %p532_p1, %p531_p0 }
  0x76   : > { %p534_p3 = pnand %p533_p2, %p527_p11 }
  0x78   : > { %537 = shalt.err (!%p534_p3)  }
  0x79   : > { %s538_s16 = scalar_lea.vmem %s866_s24, 32  ;;  %p543_p5 = scmp.lt.s32.totalorder %s866_s24, %s791_s5 }
  0x7a   : > { %p539_p4 = scmp.ne.s32.totalorder %s866_s24, %s538_s16  ;;  %p544_p6 = scmp.lt.s32.totalorder %s816_s11, %s538_s16 }
  0x7c   : > { %p545_p8 = por %p544_p6, %p543_p5 }
  0x7e   : > { %p546_p10 = pnand %p545_p8, %p539_p4 }
  0x80   : > { %549 = shalt.err (!%p546_p10)  }
  0x81   : > { %144 = dma.hbm_to_vmem [thread:$0]  %s134_s23, 32, %s866_s24, [#allocation3], %s709_s12, %s709_s12, %s710_s13 }
  0x82   : > { %s154_s28 = sshrl.u32 %s869_s9, 3  ;;  %s155_s3 = sand.u32 7, %s869_s9  }
  0x83   : > { %s386_s7 = sshll.u32 %s154_s28, 4  ;;  %s714_s22 = smov [#allocation2 + $0x5]  }
  0x84   : > { %s157_s19 = sadd.s32 %s386_s7, %s155_s3  ;;  %s191_s0 = sshll.u32 %s714_s22, 4  ;;  %s896_s0 = int_to_ptr.vmem [resolvable:$true] %s191_s0 }
  0x85   : > { %s387_s14 = sshll.u32 %s157_s19, 4  ;;  %s179_s8 = sshrl.u32 %s879_s17, 3 }
  0x86   : > { %s159_s4 = scalar_lea.hbm %s1009_s1, %s387_s14 }
  0x87   : > { %s550_s10 = scalar_lea.hbm %s159_s4, 32  ;;  %p553_p12 = scmp.lt.u32.totalorder %s159_s4, %s1009_s1 }
  0x88   : > { %p551_p11 = scmp.ne.s32.totalorder %s159_s4, %s550_s10  ;;  %p554_p13 = scmp.lt.u32.totalorder %s807_s6, %s550_s10 }
  0x89   : > { %p556_p1 = scmp.lt.u32.totalorder %s550_s10, %s159_s4 }
  0x8a   : > { %p555_p0 = por %p554_p13, %p553_p12 }
  0x8c   : > { %p557_p2 = por %p556_p1, %p555_p0 }
  0x8e   : > { %p558_p3 = pnand %p557_p2, %p551_p11 }
  0x90   : > { %561 = shalt.err (!%p558_p3)  }
  0x91   : > { %s562_s24 = scalar_lea.vmem %s873_s27, 32  ;;  %p567_p5 = scmp.lt.s32.totalorder %s873_s27, %s791_s5 }
  0x92   : > { %p563_p4 = scmp.ne.s32.totalorder %s873_s27, %s562_s24  ;;  %p568_p6 = scmp.lt.s32.totalorder %s816_s11, %s562_s24 }
  0x94   : > { %p569_p8 = por %p568_p6, %p567_p5 }
  0x96   : > { %p570_p10 = pnand %p569_p8, %p563_p4 }
  0x98   : > { %573 = shalt.err (!%p570_p10)  }
  0x99   : > { %169 = dma.hbm_to_vmem [thread:$0]  %s159_s4, 32, %s873_s27, [#allocation3], %s709_s12, %s709_s12, %s710_s13 }
  0x9a   : > { %s180_s9 = sand.u32 7, %s879_s17   ;;  %s389_s23 = sshll.u32 %s179_s8, 4 }
  0x9b   : > { %s182_s28 = sadd.s32 %s389_s23, %s180_s9  ;;  %s202_s3 = sadd.s32 6, %s784_s29 }
  0x9c   : > { %s390_s7 = sshll.u32 %s182_s28, 4  ;;  %s203_s19 = sld [smem:[#allocation5 + %s202_s3]] }
  0x9d   : > { %s184_s15 = scalar_lea.hbm %s1009_s1, %s390_s7 }
  0x9e   : > { %s574_s18 = scalar_lea.hbm %s184_s15, 32  ;;  %p577_p12 = scmp.lt.u32.totalorder %s184_s15, %s1009_s1 }
  0x9f   : > { %p575_p11 = scmp.ne.s32.totalorder %s184_s15, %s574_s18  ;;  %p578_p13 = scmp.lt.u32.totalorder %s807_s6, %s574_s18 }
  0xa0   : > { %p580_p1 = scmp.lt.u32.totalorder %s574_s18, %s184_s15 }
  0xa1   : > { %p579_p0 = por %p578_p13, %p577_p12 }
  0xa3   : > { %p581_p2 = por %p580_p1, %p579_p0 }
  0xa5   : > { %p582_p3 = pnand %p581_p2, %p575_p11 }
  0xa7   : > { %585 = shalt.err (!%p582_p3)  }
  0xa8   : > { %s586_s27 = scalar_lea.vmem %s896_s0, 32  ;;  %p591_p5 = scmp.lt.s32.totalorder %s896_s0, %s791_s5 }
  0xa9   : > { %p587_p4 = scmp.ne.s32.totalorder %s896_s0, %s586_s27  ;;  %p592_p6 = scmp.lt.s32.totalorder %s816_s11, %s586_s27 }
  0xab   : > { %p593_p8 = por %p592_p6, %p591_p5 }
  0xad   : > { %p594_p10 = pnand %p593_p8, %p587_p4 }
  0xaf   : > { %597 = shalt.err (!%p594_p10)  }
  0xb0   : > { %194 = dma.hbm_to_vmem [thread:$0]  %s184_s15, 32, %s896_s0, [#allocation3], %s709_s12, %s709_s12, %s710_s13 }
  0xb1   : > { %s227_s17 = sadd.s32 7, %s784_s29  ;;  %s715_s8 = smov [#allocation2 + $0x6]  }
  0xb2   : > { %s934_s4 = sld [smem:[#allocation5 + %s227_s17]]  ;;  %s216_s16 = sshll.u32 %s715_s8, 4  ;;  %s217_s16 = int_to_ptr.vmem [resolvable:$true] %s216_s16 }
  0xb3   : > { %s204_s24 = sshrl.u32 %s203_s19, 3  ;;  %s205_s9 = sand.u32 7, %s203_s19  }
  0xb4   : > { %s392_s23 = sshll.u32 %s204_s24, 4  ;;  %s716_s7 = smov [#allocation2 + $0x7]  }
  0xb5   : > { %s207_s28 = sadd.s32 %s392_s23, %s205_s9  ;;  %s241_s22 = sshll.u32 %s716_s7, 4  ;;  %s242_s22 = int_to_ptr.vmem [resolvable:$true] %s241_s22 }
  0xb6   : > { %s393_s3 = sshll.u32 %s207_s28, 4 }
  0xb7   : > { %s209_s10 = scalar_lea.hbm %s1009_s1, %s393_s3 }
  0xb8   : > { %s229_s0 = sshrl.u32 %s934_s4, 3  ;;  %s598_s15 = scalar_lea.hbm %s209_s10, 32 }
  0xb9   : > { %p599_p11 = scmp.ne.s32.totalorder %s209_s10, %s598_s15  ;;  %p601_p12 = scmp.lt.u32.totalorder %s209_s10, %s1009_s1 }
  0xba   : > { %p602_p13 = scmp.lt.u32.totalorder %s807_s6, %s598_s15  ;;  %p604_p1 = scmp.lt.u32.totalorder %s598_s15, %s209_s10 }
  0xbc   : > { %p603_p0 = por %p602_p13, %p601_p12 }
  0xbe   : > { %p605_p2 = por %p604_p1, %p603_p0 }
  0xc0   : > { %p606_p3 = pnand %p605_p2, %p599_p11 }
  0xc2   : > { %609 = shalt.err (!%p606_p3)  }
  0xc3   : > { %s610_s19 = scalar_lea.vmem %s217_s16, 32  ;;  %p615_p5 = scmp.lt.s32.totalorder %s217_s16, %s791_s5 }
  0xc4   : > { %p611_p4 = scmp.ne.s32.totalorder %s217_s16, %s610_s19  ;;  %p616_p6 = scmp.lt.s32.totalorder %s816_s11, %s610_s19 }
  0xc6   : > { %p617_p8 = por %p616_p6, %p615_p5 }
  0xc8   : > { %p618_p10 = pnand %p617_p8, %p611_p4 }
  0xca   : > { %621 = shalt.err (!%p618_p10)  }
  0xcb   : > { %219 = dma.hbm_to_vmem [thread:$0]  %s209_s10, 32, %s217_s16, [#allocation3], %s709_s12, %s709_s12, %s710_s13 }
  0xcc   : > { %s230_s17 = sand.u32 7, %s934_s4   ;;  %s395_s8 = sshll.u32 %s229_s0, 4 }
  0xcd   : > { %s232_s24 = sadd.s32 %s395_s8, %s230_s17 }
  0xce   : > { %s396_s9 = sshll.u32 %s232_s24, 4 }
  0xcf   : > { %s234_s3 = scalar_lea.hbm %s1009_s1, %s396_s9 }
  0xd0   : > { %s622_s7 = scalar_lea.hbm %s234_s3, 32  ;;  %p625_p12 = scmp.lt.u32.totalorder %s234_s3, %s1009_s1 }
  0xd1   : > { %p623_p11 = scmp.ne.s32.totalorder %s234_s3, %s622_s7  ;;  %p626_p13 = scmp.lt.u32.totalorder %s807_s6, %s622_s7 }
  0xd2   : > { %p628_p1 = scmp.lt.u32.totalorder %s622_s7, %s234_s3 }
  0xd3   : > { %p627_p0 = por %p626_p13, %p625_p12 }
  0xd5   : > { %p629_p2 = por %p628_p1, %p627_p0 }
  0xd7   : > { %p630_p3 = pnand %p629_p2, %p623_p11 }
  0xd9   : > { %633 = shalt.err (!%p630_p3)  }
  0xda   : > { %s634_s4 = scalar_lea.vmem %s242_s22, 32  ;;  %p639_p5 = scmp.lt.s32.totalorder %s242_s22, %s791_s5 }
  0xdb   : > { %p635_p4 = scmp.ne.s32.totalorder %s242_s22, %s634_s4  ;;  %p640_p6 = scmp.lt.s32.totalorder %s816_s11, %s634_s4 }
  0xdd   : > { %p641_p8 = por %p640_p6, %p639_p5 }
  0xdf   : > { %p642_p10 = pnand %p641_p8, %p635_p4 }
  0xe1   : > { %645 = shalt.err (!%p642_p10)  }
  0xe2   : > { %244 = dma.hbm_to_vmem [thread:$0]  %s234_s3, 32, %s242_s22, [#allocation3], %s709_s12, %s709_s12, %s710_s13 }
  0xe3   : > { %s51_s6 = scalar_lea.vmem [#allocation6], %s788_s30 }
  0xe4   : > { %688 = dma.done.wait [#allocation3], 256 }
  0xe5   : > { %689 = vsyncadd [#allocation3], 4294967040  ;;  %s267_s16 = sshll.u32 %s51_s6, 4  ;;  %v249_v0 = vld [vmem:[#allocation2] sm:$0xff]  ;;  %v250_v1 = vld [vmem:[#allocation2 + $0x8] sm:$0xff]  ;;  %s967_s10 = scalar_lea.hbm %s1010_s2, %s784_s29  ;;  %s969_s16 = int_to_ptr.vmem [resolvable:$true] %s267_s16 }
  0xe6   : > { %v251_v2 = vadd.f32 %v250_v1, %v249_v0  ;;  %s1022_s30 = sand.u32 1, %s700_s20   ;;  %s646_s13 = scalar_lea.vmem %s969_s16, 128 }
  0xe7   : > { %s254_s12 = scalar_lea.sflag [#allocation7], %s1022_s30  ;;  %p647_p11 = scmp.ne.s32.totalorder %s969_s16, %s646_s13 }
  0xe8   : > { %252 = vst [vmem:[%s51_s6] sm:$0xff] %v251_v2  ;;  %s717_s22 = smov [#allocation6]  }
  0xe9   : > { %p648_p12 = pnand %p647_p11, %p773_p7  ;;  %s650_s0 = sshll.u32 %s717_s22, 4  ;;  %s651_s0 = int_to_ptr.vmem [resolvable:$false] %s650_s0 }
  0xea   : > { %s652_s15 = scalar_lea.vmem %s651_s0, 256  ;;  %p653_p0 = scmp.lt.s32.totalorder %s969_s16, %s651_s0 }
  0xeb   : > { %p649_p13 = pneg %p648_p12  ;;  %p654_p1 = scmp.lt.s32.totalorder %s652_s15, %s646_s13 }
  0xed   : > { %p655_p2 = por %p654_p1, %p653_p0 }
  0xef   : > { %p656_p3 = pnand %p655_p2, %p649_p13 }
  0xf1   : > { %659 = shalt.err (!%p656_p3)
}
  0xf2   : > { %s660_s29 = scalar_lea.hbm %s967_s10, 128  ;;  %s664_s19 = scalar_lea.hbm %s1010_s2, 256 }
  0xf3   : > { %p661_p4 = scmp.ne.s32.totalorder %s967_s10, %s660_s29  ;;  %p665_p8 = scmp.lt.u32.totalorder %s967_s10, %s1010_s2 }
  0xf4   : > { %p666_p10 = scmp.lt.u32.totalorder %s664_s19, %s660_s29  ;;  %p668_p12 = scmp.lt.u32.totalorder %s660_s29, %s967_s10 }
  0xf5   : > { %p662_p5 = pnand %p661_p4, %p773_p7 }
  0xf6   : > { %p667_p11 = por %p666_p10, %p665_p8 }
  0xf7   : > { %p663_p6 = pneg %p662_p5 }
  0xf8   : > { %p669_p13 = por %p668_p12, %p667_p11 }
  0xfa   : > { %p670_p0 = pnand %p669_p13, %p663_p6 }
  0xfc   : > { %673 = shalt.err (!%p670_p0)
}
  0xfd   : > { %402 = dma.vmem_to_hbm [thread:$0]  (%p773_p7), %s969_s16, 128, %s967_s10, %s254_s12  }
  0xfe PF: > { %s1023_s24 = sld [smem:[#allocation19_spill]]  ;;  %p408_p1 = scmp.ge.s32.totalorder %s704_s21, 1 }
 0x100   : > { %p405_p2 = pnand %p408_p1, %p777_p9 }
 0x104   : > { %s279_s23 = sand.u32 1, %s1023_s24  }
 0x105   : > { %s280_s28 = scalar_lea.sflag [#allocation7], %s279_s23 }
 0x106   : > { %691 = dma.done.wait (!%p405_p2), %s280_s28, 128  }
 0x107   : > { %693 = vsyncadd (!%p405_p2), %s280_s28, 4294967168  ;;  %s1025_s21 = sld [smem:[#allocation20_spill]]  ;;  %s1026_s3 = sld [smem:[#allocation21_spill]] }
 0x108   : > { %s1027_s19 = smov %s700_s20 }
 0x10d   : > { %p16_p3 = scmp.ge.s32.totalorder %s1025_s21, 3   ;;  %s1028_s20 = smov %s1026_s3 }
 0x10f   :  { %18 = sbr.rel (!%p16_p3) target bundleno = 15 (0xf), region = 60 }
 0x116   :  { %285 = vsyncpa [#allocation7], 1 }
 0x117   :  { %287 = vsyncpa [#allocation7 + $0x1], 1 }
 0x118   :  { %288 = vsyncmov [#allocation3] }
 0x11b   :  { %s289_s26 = vpop.sfrf %288 }
 0x11c   :  { %p401_p7 = scmp.ne.s32.totalorder %s289_s26, 0 }
 0x11e   :  { %293 = shalt.err (%p401_p7)  }

</bundles_post_ra>
